<compile_context>
chip_gen: v6e
topology: v6e:2x2x1
jax: 0.10.0
libtpu: 0.0.40
codegen_flags: <defaults>
</compile_context>

<pallas_src>
import jax
import jax.numpy as jnp
from jax.experimental import pallas as pl
from jax.experimental.pallas import tpu as pltpu


def _round_up(a, m):
    return ((a + m - 1) // m) * m


def munet_kernel(x_ref,
                 w1_ref, b1_ref,
                 w2_ref, b2_ref,
                 w3_ref, b3_ref,
                 wmu_ref, bmu_ref,
                 out_ref):
    # fc1 + relu (MXU; K padded to 8 with zero columns in the wrapper).
    h = jnp.dot(x_ref[...].astype(jnp.bfloat16), w1_ref[...],
                preferred_element_type=jnp.float32) + b1_ref[...]
    h = jnp.maximum(h, 0.0)

    # fc2 + relu (bf16 operands on MXU, f32 accumulate, f32 bias/ReLU on VPU).
    h = jnp.dot(h.astype(jnp.bfloat16), w2_ref[...],
                preferred_element_type=jnp.float32) + b2_ref[...]
    h = jnp.maximum(h, 0.0)

    # fc3 + relu
    h = jnp.dot(h.astype(jnp.bfloat16), w3_ref[...],
                preferred_element_type=jnp.float32) + b3_ref[...]
    h = jnp.maximum(h, 0.0)

    # fc_mu + tanh * 2 ; output lanes padded only to 8 -> narrow HBM writeback.
    mu = jnp.dot(h.astype(jnp.bfloat16), wmu_ref[...],
                 preferred_element_type=jnp.float32) + bmu_ref[...]
    out_ref[...] = (jnp.tanh(mu) * 2.0).astype(out_ref.dtype)


def munet_forward(x, params, *, block_rows=1024):
    """x: [B, state_dim] float32.  params: dict with weights stored [in, out]."""
    B, state_dim = x.shape
    action_dim = params["wmu"].shape[1]
    hidden1 = params["w1"].shape[1]

    k_pad = max(8, _round_up(state_dim, 8))        # pad tiny K for the MXU
    n_store = max(8, _round_up(action_dim, 8))     # narrow, legal output block

    # Parameters: matmul operands in bf16, biases in f32.
    w1 = jnp.zeros((k_pad, hidden1), jnp.bfloat16).at[:state_dim, :].set(
        params["w1"].astype(jnp.bfloat16))
    b1 = params["b1"].astype(jnp.float32).reshape(1, -1)
    w2 = params["w2"].astype(jnp.bfloat16)
    b2 = params["b2"].astype(jnp.float32).reshape(1, -1)
    w3 = params["w3"].astype(jnp.bfloat16)
    b3 = params["b3"].astype(jnp.float32).reshape(1, -1)
    wmu = jnp.zeros((w3.shape[1], n_store), jnp.bfloat16).at[:, :action_dim].set(
        params["wmu"].astype(jnp.bfloat16))
    bmu = jnp.zeros((1, n_store), jnp.float32).at[:, :action_dim].set(
        params["bmu"].reshape(1, -1).astype(jnp.float32))

    # Batch tiling: >=2 tiles whenever the batch allows (so v7x's two cores both
    # get work), balanced tile sizes to minimize tail padding, large tiles to
    # amortize per-grid-step overhead.
    B8 = _round_up(B, 8)
    target_tiles = 2 if B8 >= 16 else 1
    tm = min(block_rows, _round_up(pl.cdiv(B8, target_tiles), 8))
    n_tiles = pl.cdiv(B8, tm)
    tm = _round_up(pl.cdiv(B8, n_tiles), 8)        # rebalance tiles
    Bp = n_tiles * tm

    x = jnp.pad(x.astype(jnp.float32),
                ((0, Bp - B), (0, k_pad - state_dim)))

    in_specs = [
        pl.BlockSpec((tm, k_pad), lambda i: (i, 0)),   # x: batch-tiled
        pl.BlockSpec(w1.shape, lambda i: (0, 0)),      # params: VMEM-resident
        pl.BlockSpec(b1.shape, lambda i: (0, 0)),
        pl.BlockSpec(w2.shape, lambda i: (0, 0)),
        pl.BlockSpec(b2.shape, lambda i: (0, 0)),
        pl.BlockSpec(w3.shape, lambda i: (0, 0)),
        pl.BlockSpec(b3.shape, lambda i: (0, 0)),
        pl.BlockSpec(wmu.shape, lambda i: (0, 0)),
        pl.BlockSpec(bmu.shape, lambda i: (0, 0)),
    ]
    out_spec = pl.BlockSpec((tm, n_store), lambda i: (i, 0))

    out = pl.pallas_call(
        munet_kernel,
        grid=(n_tiles,),
        in_specs=in_specs,
        out_specs=out_spec,
        out_shape=jax.ShapeDtypeStruct((Bp, n_store), jnp.float32),
        compiler_params=pltpu.CompilerParams(
            dimension_semantics=("parallel",)),
    )(x, w1, b1, w2, b2, w3, b3, wmu, bmu)

    return out[:B, :action_dim]


def init_munet_params(key, state_dim, action_dim):
    """PyTorch nn.Linear-style init: U[-1/sqrt(fan_in), +1/sqrt(fan_in)]."""
    def linear(key, fan_in, fan_out):
        kw, kb = jax.random.split(key)
        bound = 1.0 / (float(fan_in) ** 0.5)
        # Stored as [in, out] (transposed vs torch's [out, in]) so y = x @ W + b.
        w = jax.random.uniform(kw, (fan_in, fan_out), jnp.float32, -bound, bound)
        b = jax.random.uniform(kb, (1, fan_out), jnp.float32, -bound, bound)
        return w, b

    k1, k2, k3, k4 = jax.random.split(key, 4)
    w1, b1 = linear(k1, state_dim, 256)
    w2, b2 = linear(k2, 256, 128)
    w3, b3 = linear(k3, 128, 128)
    wmu, bmu = linear(k4, 128, action_dim)
    return {"w1": w1, "b1": b1, "w2": w2, "b2": b2,
            "w3": w3, "b3": b3, "wmu": wmu, "bmu": bmu}


if __name__ == "__main__":
    # Pendulum-v1: state_dim=3, action_dim=1.  Small batch.
    state_dim, action_dim, batch = 3, 1, 8

    key = jax.random.PRNGKey(0)
    kx, kp = jax.random.split(key)

    x = jax.random.normal(kx, (batch, state_dim), jnp.float32)
    params = init_munet_params(kp, state_dim, action_dim)

    mu = munet_forward(x, params)
    jax.block_until_ready(mu)

    # Reference in plain JAX with matching numerics
    # (bf16 matmul operands, f32 accumulation/bias/ReLU/tanh).
    def ref(x, p):
        def mm(a, w):
            return jnp.dot(a.astype(jnp.bfloat16).astype(jnp.float32),
                           w.astype(jnp.bfloat16).astype(jnp.float32))
        h = jnp.maximum(mm(x, p["w1"]) + p["b1"], 0.0)
        h = jnp.maximum(mm(h, p["w2"]) + p["b2"], 0.0)
        h = jnp.maximum(mm(h, p["w3"]) + p["b3"], 0.0)
        return jnp.tanh(mm(h, p["wmu"]) + p["bmu"]) * 2.0

    expected = ref(x, params)
    assert mu.shape == (batch, action_dim)
    assert jnp.allclose(mu, expected, atol=2e-3, rtol=2e-3), (
        float(jnp.max(jnp.abs(mu - expected))))

    print("KERNEL_OK")
</pallas_src>

<mosaic_0001>
module attributes {stable_mosaic.version = 11 : i64} {
  func.func @munet_kernel(%arg0: i32, %arg1: memref<8x8xf32, #tpu.memory_space<vmem>>, %arg2: memref<8x256xbf16, #tpu.memory_space<vmem>>, %arg3: memref<1x256xf32, #tpu.memory_space<vmem>>, %arg4: memref<256x128xbf16, #tpu.memory_space<vmem>>, %arg5: memref<1x128xf32, #tpu.memory_space<vmem>>, %arg6: memref<128x128xbf16, #tpu.memory_space<vmem>>, %arg7: memref<1x128xf32, #tpu.memory_space<vmem>>, %arg8: memref<128x8xbf16, #tpu.memory_space<vmem>>, %arg9: memref<1x8xf32, #tpu.memory_space<vmem>>, %arg10: memref<8x8xf32, #tpu.memory_space<vmem>>) attributes {dimension_semantics = [#tpu.dimension_semantics<parallel>], iteration_bounds = array<i64: 1>, scalar_prefetch = 0 : i64, scratch_operands = 0 : i64, tpu.core_type = #tpu.core_type<tc>, window_params = [{transform_indices = @transform_0, window_bounds = array<i64: 8, 8>}, {pipeline_mode = #tpu.pipeline_mode<synchronous>, transform_indices = @transform_1, window_bounds = array<i64: 8, 256>}, {pipeline_mode = #tpu.pipeline_mode<synchronous>, transform_indices = @transform_2, window_bounds = array<i64: 1, 256>}, {pipeline_mode = #tpu.pipeline_mode<synchronous>, transform_indices = @transform_3, window_bounds = array<i64: 256, 128>}, {pipeline_mode = #tpu.pipeline_mode<synchronous>, transform_indices = @transform_4, window_bounds = array<i64: 1, 128>}, {pipeline_mode = #tpu.pipeline_mode<synchronous>, transform_indices = @transform_5, window_bounds = array<i64: 128, 128>}, {pipeline_mode = #tpu.pipeline_mode<synchronous>, transform_indices = @transform_6, window_bounds = array<i64: 1, 128>}, {pipeline_mode = #tpu.pipeline_mode<synchronous>, transform_indices = @transform_7, window_bounds = array<i64: 128, 8>}, {pipeline_mode = #tpu.pipeline_mode<synchronous>, transform_indices = @transform_8, window_bounds = array<i64: 1, 8>}, {transform_indices = @transform_9, window_bounds = array<i64: 8, 8>}]} {
    %c0 = arith.constant 0 : index
    %c0_0 = arith.constant 0 : index
    %0 = vector.load %arg1[%c0, %c0_0] : memref<8x8xf32, #tpu.memory_space<vmem>>, vector<8x8xf32>
    %1 = arith.truncf %0 : vector<8x8xf32> to vector<8x8xbf16>
    %c0_1 = arith.constant 0 : index
    %c0_2 = arith.constant 0 : index
    %2 = vector.load %arg2[%c0_1, %c0_2] : memref<8x256xbf16, #tpu.memory_space<vmem>>, vector<8x256xbf16>
    %cst = arith.constant dense<0.000000e+00> : vector<8x256xf32>
    %3 = tpu.matmul %1, %2, %cst {dimension_numbers = #tpu.dot_dimension_numbers<[1], [0], [0], [1], [0, 0, 1, 1], [], []>} : vector<8x8xbf16>, vector<8x256xbf16>, vector<8x256xf32> -> vector<8x256xf32>
    %c0_3 = arith.constant 0 : index
    %c0_4 = arith.constant 0 : index
    %4 = vector.load %arg3[%c0_3, %c0_4] : memref<1x256xf32, #tpu.memory_space<vmem>>, vector<1x256xf32>
    %5 = vector.broadcast %4 : vector<1x256xf32> to vector<8x256xf32>
    %6 = arith.addf %3, %5 : vector<8x256xf32>
    %cst_5 = arith.constant 0.000000e+00 : f32
    %7 = vector.broadcast %cst_5 : f32 to vector<8x256xf32>
    %8 = arith.maximumf %6, %7 : vector<8x256xf32>
    %9 = arith.truncf %8 : vector<8x256xf32> to vector<8x256xbf16>
    %c0_6 = arith.constant 0 : index
    %c0_7 = arith.constant 0 : index
    %10 = vector.load %arg4[%c0_6, %c0_7] : memref<256x128xbf16, #tpu.memory_space<vmem>>, vector<256x128xbf16>
    %cst_8 = arith.constant dense<0.000000e+00> : vector<8x128xf32>
    %11 = tpu.matmul %9, %10, %cst_8 {dimension_numbers = #tpu.dot_dimension_numbers<[1], [0], [0], [1], [0, 0, 1, 1], [], []>} : vector<8x256xbf16>, vector<256x128xbf16>, vector<8x128xf32> -> vector<8x128xf32>
    %c0_9 = arith.constant 0 : index
    %c0_10 = arith.constant 0 : index
    %12 = vector.load %arg5[%c0_9, %c0_10] : memref<1x128xf32, #tpu.memory_space<vmem>>, vector<1x128xf32>
    %13 = vector.broadcast %12 : vector<1x128xf32> to vector<8x128xf32>
    %14 = arith.addf %11, %13 : vector<8x128xf32>
    %cst_11 = arith.constant 0.000000e+00 : f32
    %15 = vector.broadcast %cst_11 : f32 to vector<8x128xf32>
    %16 = arith.maximumf %14, %15 : vector<8x128xf32>
    %17 = arith.truncf %16 : vector<8x128xf32> to vector<8x128xbf16>
    %c0_12 = arith.constant 0 : index
    %c0_13 = arith.constant 0 : index
    %18 = vector.load %arg6[%c0_12, %c0_13] : memref<128x128xbf16, #tpu.memory_space<vmem>>, vector<128x128xbf16>
    %cst_14 = arith.constant dense<0.000000e+00> : vector<8x128xf32>
    %19 = tpu.matmul %17, %18, %cst_14 {dimension_numbers = #tpu.dot_dimension_numbers<[1], [0], [0], [1], [0, 0, 1, 1], [], []>} : vector<8x128xbf16>, vector<128x128xbf16>, vector<8x128xf32> -> vector<8x128xf32>
    %c0_15 = arith.constant 0 : index
    %c0_16 = arith.constant 0 : index
    %20 = vector.load %arg7[%c0_15, %c0_16] : memref<1x128xf32, #tpu.memory_space<vmem>>, vector<1x128xf32>
    %21 = vector.broadcast %20 : vector<1x128xf32> to vector<8x128xf32>
    %22 = arith.addf %19, %21 : vector<8x128xf32>
    %cst_17 = arith.constant 0.000000e+00 : f32
    %23 = vector.broadcast %cst_17 : f32 to vector<8x128xf32>
    %24 = arith.maximumf %22, %23 : vector<8x128xf32>
    %25 = arith.truncf %24 : vector<8x128xf32> to vector<8x128xbf16>
    %c0_18 = arith.constant 0 : index
    %c0_19 = arith.constant 0 : index
    %26 = vector.load %arg8[%c0_18, %c0_19] : memref<128x8xbf16, #tpu.memory_space<vmem>>, vector<128x8xbf16>
    %cst_20 = arith.constant dense<0.000000e+00> : vector<8x8xf32>
    %27 = tpu.matmul %25, %26, %cst_20 {dimension_numbers = #tpu.dot_dimension_numbers<[1], [0], [0], [1], [0, 0, 1, 1], [], []>} : vector<8x128xbf16>, vector<128x8xbf16>, vector<8x8xf32> -> vector<8x8xf32>
    %c0_21 = arith.constant 0 : index
    %c0_22 = arith.constant 0 : index
    %28 = vector.load %arg9[%c0_21, %c0_22] : memref<1x8xf32, #tpu.memory_space<vmem>>, vector<1x8xf32>
    %29 = vector.broadcast %28 : vector<1x8xf32> to vector<8x8xf32>
    %30 = arith.addf %27, %29 : vector<8x8xf32>
    %31 = math.tanh %30 : vector<8x8xf32>
    %cst_23 = arith.constant 2.000000e+00 : f32
    %32 = vector.broadcast %cst_23 : f32 to vector<8x8xf32>
    %33 = arith.mulf %31, %32 : vector<8x8xf32>
    %c0_24 = arith.constant 0 : index
    %c0_25 = arith.constant 0 : index
    %34 = vector.load %arg10[%c0_24, %c0_25] : memref<8x8xf32, #tpu.memory_space<vmem>>, vector<8x8xf32>
    tpu.vector_store %arg10[%c0_24, %c0_25], %33 {strides = array<i32>} : memref<8x8xf32, #tpu.memory_space<vmem>>, vector<8x8xf32>,
    return
  }
  func.func @transform_0(%arg0: i32) -> (i32, i32) {
    %c0_i32 = arith.constant 0 : i32
    %c0_i32_0 = arith.constant 0 : i32
    return %arg0, %c0_i32 : i32, i32
  }
  func.func @transform_1(%arg0: i32) -> (i32, i32) {
    %c0_i32 = arith.constant 0 : i32
    %c0_i32_0 = arith.constant 0 : i32
    %c0_i32_1 = arith.constant 0 : i32
    return %c0_i32, %c0_i32_0 : i32, i32
  }
  func.func @transform_2(%arg0: i32) -> (i32, i32) {
    %c0_i32 = arith.constant 0 : i32
    %c0_i32_0 = arith.constant 0 : i32
    %c0_i32_1 = arith.constant 0 : i32
    return %c0_i32, %c0_i32_0 : i32, i32
  }
  func.func @transform_3(%arg0: i32) -> (i32, i32) {
    %c0_i32 = arith.constant 0 : i32
    %c0_i32_0 = arith.constant 0 : i32
    %c0_i32_1 = arith.constant 0 : i32
    return %c0_i32, %c0_i32_0 : i32, i32
  }
  func.func @transform_4(%arg0: i32) -> (i32, i32) {
    %c0_i32 = arith.constant 0 : i32
    %c0_i32_0 = arith.constant 0 : i32
    %c0_i32_1 = arith.constant 0 : i32
    return %c0_i32, %c0_i32_0 : i32, i32
  }
  func.func @transform_5(%arg0: i32) -> (i32, i32) {
    %c0_i32 = arith.constant 0 : i32
    %c0_i32_0 = arith.constant 0 : i32
    %c0_i32_1 = arith.constant 0 : i32
    return %c0_i32, %c0_i32_0 : i32, i32
  }
  func.func @transform_6(%arg0: i32) -> (i32, i32) {
    %c0_i32 = arith.constant 0 : i32
    %c0_i32_0 = arith.constant 0 : i32
    %c0_i32_1 = arith.constant 0 : i32
    return %c0_i32, %c0_i32_0 : i32, i32
  }
  func.func @transform_7(%arg0: i32) -> (i32, i32) {
    %c0_i32 = arith.constant 0 : i32
    %c0_i32_0 = arith.constant 0 : i32
    %c0_i32_1 = arith.constant 0 : i32
    return %c0_i32, %c0_i32_0 : i32, i32
  }
  func.func @transform_8(%arg0: i32) -> (i32, i32) {
    %c0_i32 = arith.constant 0 : i32
    %c0_i32_0 = arith.constant 0 : i32
    %c0_i32_1 = arith.constant 0 : i32
    return %c0_i32, %c0_i32_0 : i32, i32
  }
  func.func @transform_9(%arg0: i32) -> (i32, i32) {
    %c0_i32 = arith.constant 0 : i32
    %c0_i32_0 = arith.constant 0 : i32
    return %arg0, %c0_i32 : i32, i32
  }
}

</mosaic_0001>

<bundles_post_ra>
// kernel: tpu_custom_call.1
= control target key start
LH: loop header
LB: loop body
LE: loop exit
PB: predicated region body
PF: predicated region fallthrough
CT: control target
= control target key end

     0   :  { %14 = vsyncpa [#allocation3], 0  ;;  %s1005_s0 = inlined_call_operand.vmem [shape: f32[8,8], index: 0, kind: input, shape index: {}]   ;;  %s1006_s1 = inlined_call_operand.hbm [shape: bf16[8,256], index: 1, kind: input, shape index: {}]   ;;  %s1007_s2 = inlined_call_operand.vmem [shape: f32[1,256], index: 2, kind: input, shape index: {}]   ;;  %s1008_s3 = inlined_call_operand.hbm [shape: bf16[256,128], index: 3, kind: input, shape index: {}]   ;;  %s1009_s4 = inlined_call_operand.hbm [shape: f32[1,128], index: 4, kind: input, shape index: {}]   ;;  %s1010_s5 = inlined_call_operand.vmem [shape: bf16[128,128], index: 5, kind: input, shape index: {}]   ;;  %s1011_s6 = inlined_call_operand.hbm [shape: f32[1,128], index: 6, kind: input, shape index: {}]   ;;  %s1012_s7 = inlined_call_operand.vmem [shape: bf16[128,8], index: 7, kind: input, shape index: {}]   ;;  %s1013_s8 = inlined_call_operand.vmem [shape: f32[1,8], index: 8, kind: input, shape index: {}]   ;;  %s1014_s9 = inlined_call_operand.hbm [shape: f32[8,8], index: 9, kind: output, shape index: {}]  }
   0x1   :  { %15 = vsyncpa [#allocation6], 0 }
   0x2   :  { %16 = vsyncpa [#allocation9], 0 }
   0x3   :  { %17 = vsyncpa [#allocation4], 0  ;;  %s853_s30 = smov [#allocation5]  }
   0x4   :  { %s37_s10 = sshll.u32 %s853_s30, 4  ;;  %s38_s10 = int_to_ptr.vmem [resolvable:$true] %s37_s10 }
   0x5   :  { %s753_s11 = scalar_lea.vmem %s38_s10, 2048  ;;  %p758_p1 = scmp.lt.s32.totalorder %s38_s10, %s38_s10 }
   0x6   :  { %p754_p0 = scmp.ne.s32.totalorder %s38_s10, %s753_s11  ;;  %p759_p2 = scmp.lt.s32.totalorder %s753_s11, %s753_s11 }
   0x8   :  { %p760_p3 = por %p759_p2, %p758_p1 }
   0xa   :  { %p761_p4 = pnand %p760_p3, %p754_p0 }
   0xc   :  { %764 = shalt.err (!%p761_p4)
}
   0xd   :  { %s854_s12 = smov 64   ;;  %s855_s13 = smov 4  }
   0xe   :  { %43 = dma.hbm_to_vmem [thread:$0]  %s1008_s3, 2048, %s38_s10, [#allocation6], %s854_s12, %s854_s12, %s855_s13  }
   0xf   :  { %s856_s16 = smov [#allocation2]   ;;  %s857_s18 = smov [#allocation7]  }
  0x10   :  { %s26_s17 = sshll.u32 %s856_s16, 4  ;;  %s50_s19 = sshll.u32 %s857_s18, 4  ;;  %s27_s17 = int_to_ptr.vmem [resolvable:$true] %s26_s17  ;;  %s51_s19 = int_to_ptr.vmem [resolvable:$true] %s50_s19 }
  0x11   :  { %s773_s20 = scalar_lea.vmem %s27_s17, 128  ;;  %p778_p6 = scmp.lt.s32.totalorder %s27_s17, %s27_s17 }
  0x12   :  { %p774_p5 = scmp.ne.s32.totalorder %s27_s17, %s773_s20  ;;  %p779_p7 = scmp.lt.s32.totalorder %s773_s20, %s773_s20 }
  0x14   :  { %p780_p8 = por %p779_p7, %p778_p6 }
  0x16   :  { %p781_p9 = pnand %p780_p8, %p774_p5 }
  0x18   :  { %784 = shalt.err (!%p781_p9)
}
  0x19   :  { %29 = dma.hbm_to_vmem [thread:$0]  %s1006_s1, 128, %s27_s17, [#allocation3]  }
  0x1a   :  { %s793_s23 = scalar_lea.vmem %s51_s19, 16  ;;  %s797_s3 = scalar_lea.vmem %s51_s19, 32 }
  0x1b   :  { %p794_p10 = scmp.ne.s32.totalorder %s51_s19, %s793_s23  ;;  %p798_p11 = scmp.lt.s32.totalorder %s51_s19, %s51_s19 }
  0x1c   :  { %p799_p12 = scmp.lt.s32.totalorder %s797_s3, %s793_s23 }
  0x1e   :  { %p800_p13 = por %p799_p12, %p798_p11 }
  0x20   :  { %p801_p0 = pnand %p800_p13, %p794_p10 }
  0x22   :  { %804 = shalt.err (!%p801_p0)
}
  0x23   :  { %53 = dma.hbm_to_vmem [thread:$0]  %s1009_s4, 16, %s51_s19, [#allocation6]  }
  0x24   :  { %s858_s26 = smov [#allocation8]  }
  0x25   :  { %s62_s27 = sshll.u32 %s858_s26, 4  ;;  %s63_s27 = int_to_ptr.vmem [resolvable:$true] %s62_s27 }
  0x26   :  { %s813_s28 = scalar_lea.vmem %s63_s27, 16  ;;  %s817_s29 = scalar_lea.vmem %s63_s27, 32 }
  0x27   :  { %p814_p1 = scmp.ne.s32.totalorder %s63_s27, %s813_s28  ;;  %p818_p2 = scmp.lt.s32.totalorder %s63_s27, %s63_s27 }
  0x28   :  { %p819_p3 = scmp.lt.s32.totalorder %s817_s29, %s813_s28 }
  0x2a   :  { %p820_p4 = por %p819_p3, %p818_p2 }
  0x2c   :  { %p821_p5 = pnand %p820_p4, %p814_p1 }
  0x2e   :  { %824 = shalt.err (!%p821_p5)
}
  0x2f   :  { %65 = dma.hbm_to_vmem [thread:$0]  %s1011_s6, 16, %s63_s27, [#allocation9]  }
  0x30   :  { %845 = dma.done.wait [#allocation3], 128  }
  0x31   :  { %846 = vsyncadd [#allocation3], 4294967168 }
  0x32   :  { %847 = dma.done.wait [#allocation6], 2064  }
  0x33   :  { %848 = vsyncadd [#allocation6], 4294965232 }
  0x34   :  { %849 = dma.done.wait [#allocation9], 16  }
  0x35   :  { %850 = vsyncadd [#allocation9], 4294967280  ;;  %v859_v0 = vmov 0   ;;  %v85_v1 = vld [vmem:[#allocation2] sm:$0xff]  ;;  %vm107_vm0 = vcmask 1043456   ;;  %v713_v9 = vld [vmem:[#allocation5 + $0x70] sm:$0xff]   ;;  %v88_v29 = vlaneseq }
  0x36   :  { %146 = vmatprep.mubr.bf16.mxu0 %v859_v0  ;;  %v83_v2 = vld [vmem:[%s1005_s0] sm:$0xff]  ;;  %v581_v3 = vcombine.high %v85_v1, %v85_v1  ;;  %v580_v4 = vcombine.low %v85_v1, %v85_v1  ;;  %vm103_vm1 = vcmask 64512   ;;  %v714_v10 = vld [vmem:[#allocation5 + $0x30] sm:$0xff]   ;;  %v715_v11 = vld [vmem:[#allocation5 + $0x68] sm:$0xff]   ;;  %v860_v24 = vmov 0.0  }
  0x37   :  { %v711_v5 = vld [vmem:[#allocation5 + $0x78] sm:$0xff]   ;;  %v84_v8 = vpack.c.bf16 %v83_v2, %v83_v2  ;;  %v716_v12 = vld [vmem:[#allocation5 + $0x28] sm:$0xff]   ;;  %v717_v13 = vld [vmem:[#allocation5 + $0x60] sm:$0xff]   ;;  %v89_v30 = vshrl.u32 %v88_v29, 7  ;;  %vm861_vm2 = vmmov 0  }
  0x38   :  { %v712_v6 = vld [vmem:[#allocation5 + $0x38] sm:$0xff]   ;;  %582 = vmatprep.subr.msk.bf16.mxu0 %vm107_vm0, %v581_v3  ;;  %v109_v7 = vsel %vm107_vm0, %v580_v4, 0  ;;  %619 = vmatprep.subr.bf16.mxu1 %v711_v5  ;;  %v718_v14 = vld [vmem:[#allocation5 + $0x20] sm:$0xff]   ;;  %v721_v17 = vld [vmem:[#allocation5 + $0x50] sm:$0xff]  }
  0x39   :  { %129 = vmatpush1.bf16.msra.mxu0 %v109_v7  ;;  %620 = vmatpush3.bf16.msra.mxu1 %v712_v6  ;;  %v719_v15 = vld [vmem:[#allocation5 + $0x58] sm:$0xff]   ;;  %v722_v18 = vld [vmem:[#allocation5 + $0x10] sm:$0xff]   ;;  %v723_v19 = vld [vmem:[#allocation5 + $0x48] sm:$0xff]   ;;  %v90_v31 = vsub.s32 0, %v89_v30  ;;  %v94_v33 = vsub.s32 1, %v89_v30 }
  0x3a   :  { %621 = vmatprep.subr.bf16.mxu1 %v713_v9  ;;  %v720_v16 = vld [vmem:[#allocation5 + $0x18] sm:$0xff]   ;;  %v724_v20 = vld [vmem:[#allocation5 + $0x8] sm:$0xff]   ;;  %v725_v21 = vld [vmem:[#allocation5 + $0x40] sm:$0xff]   ;;  %659 = vmatprep.subr.bf16.mxu0 %v860_v24 }
  0x3b   :  { %v726_v22 = vld [vmem:[#allocation5] sm:$0xff]   ;;  %v727_v23 = vld [vmem:[%s1010_s5 + $0x38] sm:$0xff]   ;;  %v728_v25 = vld [vmem:[%s1010_s5 + $0x30] sm:$0xff]  }
  0x3c   :  { %583 = vmatmul.mubr.msk.bf16.vlgmr.msra.gmra.mxu0 %vm103_vm1, %v84_v8  ;;  %v729_v26 = vld [vmem:[%s1010_s5 + $0x28] sm:$0xff]   ;;  %v730_v27 = vld [vmem:[%s1010_s5 + $0x20] sm:$0xff]   ;;  %v731_v28 = vld [vmem:[%s1010_s5 + $0x18] sm:$0xff]  }
  0x3d   :  { %622 = vmatpush3.bf16.msra.mxu1 %v714_v10  ;;  %660 = vmatpush3.bf16.msra.mxu0 %v727_v23  ;;  %v86_v32 = vld [vmem:[%s1007_s2] sm:$0x3]  ;;  %v732_v46 = vld [vmem:[%s1010_s5 + $0x10] sm:$0xff]   ;;  %v733_v47 = vld [vmem:[%s1010_s5 + $0x8] sm:$0xff]  }
  0x3e   :  { %623 = vmatprep.subr.bf16.mxu1 %v715_v11  ;;  %661 = vmatprep.subr.bf16.mxu0 %v860_v24  ;;  %v91_v34 = vrot.slane %v86_v32, %v90_v31  ;;  %v95_v35 = vrot.slane %v86_v32, %v94_v33  ;;  %v734_v48 = vld [vmem:[%s1010_s5] sm:$0xff]   ;;  %v735_v49 = vld [vmem:[%s1012_s7 + $0x38] sm:$0xff]   ;;  %v736_v50 = vld [vmem:[%s1012_s7 + $0x30] sm:$0xff]  }
  0x3f   :  { %675 = vmatprep.mubr.msk.bf16.mxu0 %vm861_vm2, %v860_v24  ;;  %v737_v51 = vld [vmem:[%s1012_s7 + $0x28] sm:$0xff]   ;;  %v738_v52 = vld [vmem:[%s1012_s7 + $0x20] sm:$0xff]   ;;  %v739_v53 = vld [vmem:[%s1012_s7 + $0x18] sm:$0xff]  }
  0x40   :  { %v740_v54 = vld [vmem:[%s1012_s7 + $0x10] sm:$0xff]   ;;  %v584_v56 = vld [vmem:[#allocation7] ss:$0 sm:$0xff]  ;;  %v742_v1 = vld [vmem:[%s1012_s7] sm:$0xff]  }
  0x41   :  { %624 = vmatpush3.bf16.msra.mxu1 %v716_v12  ;;  %662 = vmatpush3.bf16.msra.mxu0 %v728_v25  ;;  %v741_v0 = vld [vmem:[%s1012_s7 + $0x8] sm:$0xff]   ;;  %v610_v10 = vld [vmem:[%s1013_s8] ss:$0 sm:$0xff]  ;;  %s862_s7 = smov [#allocation10]  }
  0x42   :  { %625 = vmatprep.subr.bf16.mxu1 %v717_v13  ;;  %663 = vmatprep.subr.bf16.mxu0 %v860_v24  ;;  %v601_v2 = vld [vmem:[#allocation8] ss:$0 sm:$0xff]  ;;  %s569_s17 = sshll.u32 %s862_s7, 4  ;;  %s570_s17 = int_to_ptr.vmem [resolvable:$true] %s569_s17 }
  0x43   :  { %s825_s18 = scalar_lea.vmem %s570_s17, 128  ;;  %p830_p7 = scmp.lt.s32.totalorder %s570_s17, %s570_s17 }
  0x44   :  { %p826_p6 = scmp.ne.s32.totalorder %s570_s17, %s825_s18  ;;  %p831_p8 = scmp.lt.s32.totalorder %s825_s18, %s825_s18 }
  0x45   :  { %626 = vmatpush3.bf16.msra.mxu1 %v718_v14  ;;  %664 = vmatpush3.bf16.msra.mxu0 %v729_v26 }
  0x46   :  { %627 = vmatprep.subr.bf16.mxu1 %v719_v15  ;;  %665 = vmatprep.subr.bf16.mxu0 %v860_v24  ;;  %p832_p9 = por %p831_p8, %p830_p7 }
  0x48   :  { %p833_p10 = pnand %p832_p9, %p826_p6 }
  0x49   :  { %628 = vmatpush3.bf16.msra.mxu1 %v720_v16  ;;  %666 = vmatpush3.bf16.msra.mxu0 %v730_v27 }
  0x4a   :  { %629 = vmatprep.subr.bf16.mxu1 %v721_v17  ;;  %667 = vmatprep.subr.bf16.mxu0 %v860_v24 }
  0x4d   :  { %630 = vmatpush3.bf16.msra.mxu1 %v722_v18  ;;  %668 = vmatpush3.bf16.msra.mxu0 %v731_v28 }
  0x4e   :  { %631 = vmatprep.subr.bf16.mxu1 %v723_v19  ;;  %669 = vmatprep.subr.bf16.mxu0 %v860_v24 }
  0x51   :  { %632 = vmatpush3.bf16.msra.mxu1 %v724_v20  ;;  %670 = vmatpush3.bf16.msra.mxu0 %v732_v46 }
  0x52   :  { %633 = vmatprep.subr.bf16.mxu1 %v725_v21  ;;  %671 = vmatprep.subr.bf16.mxu0 %v860_v24 }
  0x55   :  { %634 = vmatpush3.bf16.msra.mxu1 %v726_v22  ;;  %672 = vmatpush3.bf16.msra.mxu0 %v733_v47 }
  0x56   :  { %679 = vmatprep.subr.bf16.mxu1 %v860_v24  ;;  %673 = vmatprep.subr.bf16.mxu0 %v860_v24 }
  0x59   :  { %674 = vmatpush3.bf16.msra.mxu0 %v734_v48 }
  0xfc   :  { %v148_v36 = vpop.f32.mrf.mxu0 }
  0xfd   :  { %v149_v37 = vadd.f32 %v148_v36, %v91_v34 }
  0xfe   :  { %v150_v38 = vpop.f32.mrf.mxu0 }
  0xff   :  { %v151_v39 = vadd.f32 %v150_v38, %v95_v35  ;;  %v155_v40 = vmax.f32 %v149_v37, 0.0 }
 0x100   :  { %v152_v41 = vpop.f32.mrf.mxu0 }
 0x101   :  { %v156_v42 = vmax.f32 %v151_v39, 0.0  ;;  %v157_v45 = vpack.c.bf16 %v155_v40, %v155_v40 }
 0x102   :  { %v153_v43 = vpop.f32.mrf.mxu0 }
 0x103   :  { %v158_v44 = vpack.c.bf16 %v156_v42, %v156_v42 }
 0x105   :  { %326 = vmatprep.mubr.bf16.mxu1 %v158_v44 }
 0x106   :  { %327 = vmatmul.mubr.bf16.vlgmr.msra.gmra.mxu1 %v157_v45 }
 0x107   :  { %695 = vmatprep.mubr.msk.bf16.mxu1 %vm861_vm2, %v860_v24  ;;  %680 = vmatpush3.bf16.msra.mxu1 %v735_v49 }
 0x108   :  { %681 = vmatprep.subr.bf16.mxu1 %v860_v24 }
 0x10b   :  { %682 = vmatpush3.bf16.msra.mxu1 %v736_v50 }
 0x10c   :  { %683 = vmatprep.subr.bf16.mxu1 %v860_v24 }
 0x10f   :  { %684 = vmatpush3.bf16.msra.mxu1 %v737_v51 }
 0x110   :  { %685 = vmatprep.subr.bf16.mxu1 %v860_v24 }
 0x113   :  { %686 = vmatpush3.bf16.msra.mxu1 %v738_v52 }
 0x114   :  { %687 = vmatprep.subr.bf16.mxu1 %v860_v24 }
 0x117   :  { %688 = vmatpush3.bf16.msra.mxu1 %v739_v53 }
 0x118   :  { %689 = vmatprep.subr.bf16.mxu1 %v860_v24 }
 0x11b   :  { %690 = vmatpush3.bf16.msra.mxu1 %v740_v54 }
 0x11c   :  { %691 = vmatprep.subr.bf16.mxu1 %v860_v24 }
 0x11f   :  { %692 = vmatpush3.bf16.msra.mxu1 %v741_v0 }
 0x120   :  { %693 = vmatprep.subr.bf16.mxu1 %v860_v24 }
 0x123   :  { %694 = vmatpush3.bf16.msra.mxu1 %v742_v1 }
 0x1c6   :  { %v635_v55 = vpop.f32.mrf.mxu1 }
 0x1c8   :  { %v636_v57 = vpop.f32.mrf.mxu1 }
 0x1c9   :  { %v637_v58 = vadd.f32 %v636_v57, %v635_v55 }
 0x1ca   :  { %v638_v59 = vpop.f32.mrf.mxu1 }
 0x1cb   :  { %v329_v60 = vadd.f32 %v637_v58, %v584_v56 }
 0x1cc   :  { %v639_v61 = vpop.f32.mrf.mxu1 }
 0x1cd   :  { %v334_v62 = vmax.f32 %v329_v60, 0.0 }
 0x1cf   :  { %v335_v63 = vpack.c.bf16 %v334_v62, %v334_v62 }
 0x1d1   :  { %676 = vmatmul.mubr.bf16.vlgmr.msra.gmra.mxu0 %v335_v63 }
 0x291   :  { %v441_v3 = vpop.f32.mrf.mxu0 }
 0x292   :  { %v442_v4 = vadd.f32 %v601_v2, %v441_v3 }
 0x293   :  { %v677_v5 = vpop.f32.mrf.mxu0 }
 0x294   :  { %v447_v6 = vmax.f32 %v442_v4, 0.0 }
 0x295   :  { %v444_v7 = vpop.f32.mrf.mxu0 }
 0x296   :  { %v448_v8 = vpack.c.bf16 %v447_v6, %v447_v6 }
 0x297   :  { %v678_v9 = vpop.f32.mrf.mxu0 }
 0x298   :  { %696 = vmatmul.mubr.bf16.vlgmr.msra.gmra.mxu1 %v448_v8 }
 0x358   :  { %v554_v11 = vpop.f32.mrf.mxu1 }
 0x359   :  { %v555_v12 = vadd.f32 %v610_v10, %v554_v11 }
 0x35a   :  { %v697_v13 = vpop.f32.mrf.mxu1 }
 0x35b   :  { %743 = vtanh.f32 %v555_v12 }
 0x35c   :  { %v557_v14 = vpop.f32.mrf.mxu1 }
 0x35e   :  { %v698_v15 = vpop.f32.mrf.mxu1 }
 0x368   :  { %v744_v16 = vpop.eup %743 }
 0x369   :  { %v561_v17 = vmul.f32 2.0, %v744_v16 }
 0x36b   :  { %562 = vst.msk [vmem:[#allocation10] sm:$0xff] %vm103_vm1, %v561_v17 }
 0x36c   :  { %836 = shalt.err (!%p833_p10)
}
 0x36d   :  { %572 = dma.vmem_to_hbm [thread:$0]  %s570_s17, 128, %s1014_s9, [#allocation4]  }
 0x36e   :  { %851 = dma.done.wait [#allocation4], 128  }
 0x36f   :  { %852 = vsyncadd [#allocation4], 4294967168 }
 0x370   :  { %576 = vsyncpa [#allocation3], 1 }
 0x371   :  { %577 = vsyncpa [#allocation6], 1 }
 0x372   :  { %578 = vsyncpa [#allocation9], 1 }
 0x373   :  { %579 = vsyncpa [#allocation4], 1 }

</bundles_post_ra>
